<compile_context>
chip_gen: v7x
topology: tpu7x:2x2x1
jax: 0.10.0
libtpu: 0.0.40
codegen_flags: <defaults>
</compile_context>

<pallas_src>
import functools
import math

import numpy as np
import jax
import jax.numpy as jnp
from jax.experimental import pallas as pl
from jax.experimental.pallas import tpu as pltpu


def _round_up(a, b):
    return (a + b - 1) // b * b


def _roi_pool_kernel(gb_ref, x_ref, ah_ref, bw_ref, out_ref, *, H, W, ncol):
    # gb_ref : SMEM (NG,) int32 per-group batch index (consumed by index_map only).
    # x_ref  : VMEM (1, C, H*W)  feature map of this group's batch element.
    # ah_ref : VMEM (1, H, ncol) row factor   ah[h, g*CPR + oh*RO + ow] = mask_h/cnt_h
    # bw_ref : VMEM (1, W, ncol) col factor   bw[w, g*CPR + oh*RO + ow] = mask_w/cnt_w
    # out_ref: VMEM (1, C, ncol)
    del gb_ref
    ah = ah_ref[0]                                     # (H, ncol)
    bw = bw_ref[0]                                     # (W, ncol)
    # Rebuild the dense pooling matrix in VMEM (VPU broadcast-multiply); only the
    # two small factors were streamed from HBM.  The reshape merges leading dims
    # only (lane dim unchanged, W a multiple of 8), so it is layout-preserving.
    p = (ah[:, None, :] * bw[None, :, :]).reshape(H * W, ncol)
    pooled = jnp.dot(x_ref[0], p, preferred_element_type=jnp.float32)
    out_ref[0] = pooled.astype(out_ref.dtype)          # single lane-dense store


def roi_pooling_2d(x, rois, roi_indices, roi_size, spatial_scale, rois_per_step=4):
    """Pallas ROIPooling2d forward.

    x:            (B, C, H, W) float32 feature map (NCHW)
    rois:         (R, 4) float ROI boxes (y1, x1, y2, x2) in un-scaled coords
    roi_indices:  (R,) int batch index per ROI
    returns:      (R, C, roi_size, roi_size)
    """
    B, C, H, W = x.shape
    R = rois.shape[0]
    RO = int(roi_size)
    G = max(1, int(rois_per_step))
    # Pad each ROI's 49 output columns so the group block is a multiple of 128 lanes.
    CPR = _round_up(RO * RO, max(1, 128 // math.gcd(G, 128)))
    ncol = G * CPR

    # --- ROI boxes -> integer feature coords (torch: .float().mul_(scale).long()).
    rois_i = (rois.astype(jnp.float32) * jnp.float32(spatial_scale)).astype(jnp.int32)
    idx = jnp.clip(roi_indices.astype(jnp.int32), 0, B - 1)

    # --- sort by batch index and pad each batch's run to a multiple of G so every
    #     group of G ROIs reads a single (1, C, H*W) x block.
    order = jnp.argsort(idx)                      # sorted position -> original ROI id
    idx_s = idx[order]
    rois_s = rois_i[order]

    counts = jnp.bincount(idx, length=B)                              # (B,)
    groups_per_batch = (counts + G - 1) // G                          # (B,)
    group_start = jnp.concatenate([jnp.zeros((1,), counts.dtype),
                                   jnp.cumsum(groups_per_batch)[:-1]])
    batch_start = jnp.concatenate([jnp.zeros((1,), counts.dtype),
                                   jnp.cumsum(counts)[:-1]])
    R_alloc = _round_up(R + B * (G - 1), G)       # static upper bound on padded slots
    NG = R_alloc // G                             # static grid size

    pos = jnp.arange(R, dtype=jnp.int32)
    slot = (group_start[idx_s] * G + (pos - batch_start[idx_s])).astype(jnp.int32)

    # Per-group batch index (scalar-prefetched; drives the x BlockSpec). Trailing
    # unused groups get a valid batch index and all-zero factors (output dropped).
    g_cum = jnp.cumsum(groups_per_batch)
    group_batch = jnp.clip(
        jnp.searchsorted(g_cum, jnp.arange(NG), side="right"), 0, B - 1
    ).astype(jnp.int32)

    # --- per-ROI adaptive-avg-pool window factors ---------------------------------
    y1 = jnp.clip(rois_s[:, 0], 0, H - 1)
    x1 = jnp.clip(rois_s[:, 1], 0, W - 1)
    y2 = jnp.clip(rois_s[:, 2], y1, H - 1)
    x2 = jnp.clip(rois_s[:, 3], x1, W - 1)
    roi_h = y2 - y1 + 1                                               # >= 1
    roi_w = x2 - x1 + 1                                               # >= 1

    o = jnp.arange(RO, dtype=jnp.int32)
    h_start = (o[None, :] * roi_h[:, None]) // RO                     # (R, RO)
    h_end = ((o[None, :] + 1) * roi_h[:, None] + RO - 1) // RO
    w_start = (o[None, :] * roi_w[:, None]) // RO
    w_end = ((o[None, :] + 1) * roi_w[:, None] + RO - 1) // RO
    inv_cnt_h = 1.0 / (h_end - h_start).astype(jnp.float32)           # (R, RO)
    inv_cnt_w = 1.0 / (w_end - w_start).astype(jnp.float32)           # (R, RO)

    hh = jnp.arange(H, dtype=jnp.int32)
    ww = jnp.arange(W, dtype=jnp.int32)
    # mh[r, oh, h] = (1/cnt_h) if input row h is in output row oh's window (offset y1)
    mh = (((hh[None, None, :] >= (y1[:, None, None] + h_start[:, :, None])) &
           (hh[None, None, :] < (y1[:, None, None] + h_end[:, :, None])))
          .astype(jnp.float32) * inv_cnt_h[:, :, None])               # (R, RO, H)
    # mw[r, ow, w] = (1/cnt_w) if input col w is in output col ow's window (offset x1)
    mw = (((ww[None, None, :] >= (x1[:, None, None] + w_start[:, :, None])) &
           (ww[None, None, :] < (x1[:, None, None] + w_end[:, :, None])))
          .astype(jnp.float32) * inv_cnt_w[:, :, None])               # (R, RO, W)

    # Column-expanded small factors (this is all the kernel streams per ROI):
    #   ah[r, h, oh*RO + ow] = mh[r, oh, h]   (independent of ow)
    #   bw[r, w, oh*RO + ow] = mw[r, ow, w]   (independent of oh)
    ah_roi = jnp.broadcast_to(jnp.transpose(mh, (0, 2, 1))[:, :, :, None],
                              (R, H, RO, RO)).reshape(R, H, RO * RO)
    bw_roi = jnp.broadcast_to(jnp.transpose(mw, (0, 2, 1))[:, :, None, :],
                              (R, W, RO, RO)).reshape(R, W, RO * RO)
    pad = CPR - RO * RO
    ah_roi = jnp.pad(ah_roi, ((0, 0), (0, 0), (0, pad)))              # (R, H, CPR)
    bw_roi = jnp.pad(bw_roi, ((0, 0), (0, 0), (0, pad)))              # (R, W, CPR)

    # Scatter into padded slots (padding slots stay all-zero -> zero output, dropped).
    ah_all = jnp.zeros((R_alloc, H, CPR), jnp.float32).at[slot].set(ah_roi)
    bw_all = jnp.zeros((R_alloc, W, CPR), jnp.float32).at[slot].set(bw_roi)
    # Group layout: column j = g*CPR + oh*RO + ow.
    ah_grp = ah_all.reshape(NG, G, H, CPR).transpose(0, 2, 1, 3).reshape(NG, H, ncol)
    bw_grp = bw_all.reshape(NG, G, W, CPR).transpose(0, 2, 1, 3).reshape(NG, W, ncol)

    x_flat = x.reshape(B, C, H * W)

    # --- explicit VMEM budget (review: 64 MiB physical on v7x, 16 MiB scoped default on v5e)
    lanes = lambda n: _round_up(n, 128)
    work_set = 4 * (2 * C * lanes(H * W)            # x block, double-buffered
                    + 2 * (H + W) * lanes(ncol)     # ah + bw, double-buffered
                    + 2 * C * lanes(ncol)           # out block, double-buffered
                    + 2 * H * W * lanes(ncol))      # in-kernel P (+ headroom)
    vmem_limit = int(min(max(2 * work_set, 8 << 20), 64 << 20))

    kernel = functools.partial(_roi_pool_kernel, H=H, W=W, ncol=ncol)
    grid_spec = pltpu.PrefetchScalarGridSpec(
        num_scalar_prefetch=1,
        grid=(NG,),
        in_specs=[
            # Data-dependent batch selection; identical consecutive indices skip
            # the (1, C, H*W) re-fetch thanks to the batch-sorted, batch-aligned groups.
            pl.BlockSpec((1, C, H * W), lambda i, gb: (gb[i], 0, 0)),
            pl.BlockSpec((1, H, ncol), lambda i, gb: (i, 0, 0)),
            pl.BlockSpec((1, W, ncol), lambda i, gb: (i, 0, 0)),
        ],
        out_specs=pl.BlockSpec((1, C, ncol), lambda i, gb: (i, 0, 0)),
    )
    out_grp = pl.pallas_call(
        kernel,
        out_shape=jax.ShapeDtypeStruct((NG, C, ncol), x.dtype),
        grid_spec=grid_spec,
        compiler_params=pltpu.CompilerParams(
            dimension_semantics=("parallel",),
            vmem_limit_bytes=vmem_limit),
    )(group_batch, x_flat, ah_grp, bw_grp)

    # Un-pad / un-sort with one small gather (much smaller than the removed P stream).
    out_slots = (out_grp.reshape(NG, C, G, CPR)
                 .transpose(0, 2, 1, 3)
                 .reshape(R_alloc, C, CPR)[..., :RO * RO]
                 .reshape(R_alloc, C, RO, RO))
    slot_of_roi = jnp.zeros((R,), jnp.int32).at[order].set(slot)
    return out_slots[slot_of_roi]


def _ref_roi_pooling(x, rois, roi_indices, roi_size, spatial_scale):
    """Pure-numpy reference mirroring the PyTorch module."""
    x = np.asarray(x)
    rois_i = (np.asarray(rois, np.float32) * spatial_scale).astype(np.int64)
    idx = np.asarray(roi_indices, np.int64)
    outs = []
    for i in range(rois_i.shape[0]):
        y1, x1, y2, x2 = rois_i[i]
        feat = x[idx[i], :, y1:y2 + 1, x1:x2 + 1]
        C, h, w = feat.shape
        out = np.zeros((C, roi_size, roi_size), np.float32)
        for oh in range(roi_size):
            hs = (oh * h) // roi_size
            he = ((oh + 1) * h + roi_size - 1) // roi_size
            for ow in range(roi_size):
                ws = (ow * w) // roi_size
                we = ((ow + 1) * w + roi_size - 1) // roi_size
                out[:, oh, ow] = feat[:, hs:he, ws:we].mean(axis=(1, 2))
        outs.append(out)
    return np.stack(outs, 0)


if __name__ == "__main__":
    B, C, H, W = 2, 4, 16, 16
    R = 6
    roi_size = 7
    spatial_scale = 0.5   # original image coords ~32 -> feature coords 16

    key = jax.random.PRNGKey(0)
    kx, k1, k2, k3 = jax.random.split(key, 4)

    x = jax.random.normal(kx, (B, C, H, W), dtype=jnp.float32)
    top_left = jax.random.randint(k1, (R, 2), 0, 20)
    size = jax.random.randint(k2, (R, 2), 6, 14)
    bottom_right = jnp.minimum(top_left + size, 31)
    rois = jnp.concatenate([top_left, bottom_right], axis=1).astype(jnp.float32)
    roi_indices = jax.random.randint(k3, (R,), 0, B)

    out = roi_pooling_2d(x, rois, roi_indices, roi_size, spatial_scale)
    out = jax.block_until_ready(out)

    ref = _ref_roi_pooling(x, rois, roi_indices, roi_size, spatial_scale)
    assert out.shape == (R, C, roi_size, roi_size), out.shape
    np.testing.assert_allclose(np.asarray(out), ref, atol=1e-5, rtol=1e-5)

    print("KERNEL_OK")
</pallas_src>

<mosaic_0001>
module attributes {stable_mosaic.version = 11 : i64} {
  func.func @_roi_pool_kernel(%arg0: i32, %arg1: memref<3xi32, #tpu.memory_space<smem>>, %arg2: memref<1x4x256xf32, #tpu.memory_space<vmem>>, %arg3: memref<1x16x256xf32, #tpu.memory_space<vmem>>, %arg4: memref<1x16x256xf32, #tpu.memory_space<vmem>>, %arg5: memref<1x4x256xf32, #tpu.memory_space<vmem>>) attributes {dimension_semantics = [#tpu.dimension_semantics<parallel>], iteration_bounds = array<i64: 3>, scalar_prefetch = 1 : i64, scratch_operands = 0 : i64, tpu.core_type = #tpu.core_type<tc>, window_params = [{transform_indices = @transform_0, window_bounds = array<i64: 1, 4, 256>}, {transform_indices = @transform_1, window_bounds = array<i64: 1, 16, 256>}, {transform_indices = @transform_2, window_bounds = array<i64: 1, 16, 256>}, {transform_indices = @transform_3, window_bounds = array<i64: 1, 4, 256>}]} {
    %c0 = arith.constant 0 : index
    %c0_0 = arith.constant 0 : index
    %c0_1 = arith.constant 0 : index
    %0 = vector.load %arg3[%c0, %c0_0, %c0_1] : memref<1x16x256xf32, #tpu.memory_space<vmem>>, vector<1x16x256xf32>
    %1 = vector.shape_cast %0 : vector<1x16x256xf32> to vector<16x256xf32>
    %c0_2 = arith.constant 0 : index
    %c0_3 = arith.constant 0 : index
    %c0_4 = arith.constant 0 : index
    %2 = vector.load %arg4[%c0_2, %c0_3, %c0_4] : memref<1x16x256xf32, #tpu.memory_space<vmem>>, vector<1x16x256xf32>
    %3 = vector.shape_cast %2 : vector<1x16x256xf32> to vector<16x256xf32>
    %4 = vector.shape_cast %1 : vector<16x256xf32> to vector<16x1x256xf32>
    %5 = vector.shape_cast %3 : vector<16x256xf32> to vector<1x16x256xf32>
    %6 = vector.broadcast %4 : vector<16x1x256xf32> to vector<16x16x256xf32>
    %7 = vector.broadcast %5 : vector<1x16x256xf32> to vector<16x16x256xf32>
    %8 = arith.mulf %6, %7 : vector<16x16x256xf32>
    %9 = vector.shape_cast %8 : vector<16x16x256xf32> to vector<256x256xf32>
    %c0_5 = arith.constant 0 : index
    %c0_6 = arith.constant 0 : index
    %c0_7 = arith.constant 0 : index
    %10 = vector.load %arg2[%c0_5, %c0_6, %c0_7] : memref<1x4x256xf32, #tpu.memory_space<vmem>>, vector<1x4x256xf32>
    %11 = vector.shape_cast %10 : vector<1x4x256xf32> to vector<4x256xf32>
    %cst = arith.constant dense<0.000000e+00> : vector<4x256xf32>
    %12 = tpu.matmul %11, %9, %cst {dimension_numbers = #tpu.dot_dimension_numbers<[1], [0], [0], [1], [0, 0, 1, 1], [], []>} : vector<4x256xf32>, vector<256x256xf32>, vector<4x256xf32> -> vector<4x256xf32>
    %c0_8 = arith.constant 0 : index
    %c0_9 = arith.constant 0 : index
    %c0_10 = arith.constant 0 : index
    %13 = vector.load %arg5[%c0_8, %c0_9, %c0_10] : memref<1x4x256xf32, #tpu.memory_space<vmem>>, vector<1x4x256xf32>
    %14 = vector.shape_cast %13 : vector<1x4x256xf32> to vector<4x256xf32>
    %15 = vector.shape_cast %12 : vector<4x256xf32> to vector<1x4x256xf32>
    tpu.vector_store %arg5[%c0_8, %c0_9, %c0_10], %15 {strides = array<i32>} : memref<1x4x256xf32, #tpu.memory_space<vmem>>, vector<1x4x256xf32>,
    return
  }
  func.func @transform_0(%arg0: i32, %arg1: memref<3xi32, #tpu.memory_space<smem>>) -> (i32, i32, i32) {
    %0 = arith.index_cast %arg0 : i32 to index
    %1 = memref.load %arg1[%0] : memref<3xi32, #tpu.memory_space<smem>>
    %c0_i32 = arith.constant 0 : i32
    %c0_i32_0 = arith.constant 0 : i32
    %c0_i32_1 = arith.constant 0 : i32
    return %1, %c0_i32, %c0_i32_0 : i32, i32, i32
  }
  func.func @transform_1(%arg0: i32, %arg1: memref<3xi32, #tpu.memory_space<smem>>) -> (i32, i32, i32) {
    %c0_i32 = arith.constant 0 : i32
    %c0_i32_0 = arith.constant 0 : i32
    %c0_i32_1 = arith.constant 0 : i32
    return %arg0, %c0_i32, %c0_i32_0 : i32, i32, i32
  }
  func.func @transform_2(%arg0: i32, %arg1: memref<3xi32, #tpu.memory_space<smem>>) -> (i32, i32, i32) {
    %c0_i32 = arith.constant 0 : i32
    %c0_i32_0 = arith.constant 0 : i32
    %c0_i32_1 = arith.constant 0 : i32
    return %arg0, %c0_i32, %c0_i32_0 : i32, i32, i32
  }
  func.func @transform_3(%arg0: i32, %arg1: memref<3xi32, #tpu.memory_space<smem>>) -> (i32, i32, i32) {
    %c0_i32 = arith.constant 0 : i32
    %c0_i32_0 = arith.constant 0 : i32
    %c0_i32_1 = arith.constant 0 : i32
    return %arg0, %c0_i32, %c0_i32_0 : i32, i32, i32
  }
}

</mosaic_0001>

<bundles_post_ra>
// kernel: tpu_custom_call.1
= control target key start
LH: loop header
LB: loop body
LE: loop exit
PB: predicated region body
PF: predicated region fallthrough
CT: control target
= control target key end

     0   :  { %s1698_s0 = inlined_call_operand.hbm [shape: s32[3], index: 0, kind: input, shape index: {}]   ;;  %s1699_s1 = inlined_call_operand.hbm [shape: f32[2,4,256], index: 1, kind: input, shape index: {}]   ;;  %s1700_s2 = inlined_call_operand.hbm [shape: f32[3,16,256], index: 2, kind: input, shape index: {}]   ;;  %s1701_s3 = inlined_call_operand.hbm [shape: f32[3,16,256], index: 3, kind: input, shape index: {}]   ;;  %s1702_s4 = inlined_call_operand.hbm [shape: f32[3,4,256], index: 4, kind: output, shape index: {}]  }
   0x1   :  { %1715 = sst [smem:[#allocation20_spill]] %s1700_s2  ;;  %s1002_s17 = scalar_lea.hbm %s1698_s0, 16 }
   0x2   :  { %1716 = sst [smem:[#allocation21_spill]] %s1701_s3  ;;  %p1003_p0 = scmp.ne.s32.totalorder %s1698_s0, %s1002_s17 }
   0x3   :  { %p1006_p1 = scmp.lt.u32.totalorder %s1002_s17, %s1698_s0 }
   0x5   :  { %p1008_p2 = pnand %p1006_p1, %p1003_p0 }
   0x7   :  { %1011 = shalt.err (!%p1008_p2)  }
   0x8   :  { %s1200_s22 = smov [#allocation3]  }
   0x9   :  { %10 = dma.hbm_to_smem %s1698_s0, 16, %s1200_s22, [#allocation2] }
   0xa   :  { %1158 = dma.done.wait [#allocation2], 16 }
   0xb   :  { %1159 = vsyncadd [#allocation2], 4294967280 }
   0xc   :  { %12 = sfence }
   0xd   :  { %13 = vsyncpa [#allocation5], 0 }
   0xe   :  { %15 = vsyncpa [#allocation5 + $0x1], 0 }
   0xf   :  { %16 = vsyncpa [#allocation8], 0 }
  0x10   :  { %18 = vsyncpa [#allocation8 + $0x1], 0 }
  0x11   :  { %19 = vsyncpa [#allocation6], 0 }
  0x12   :  { %21 = vsyncpa [#allocation6 + $0x1], 0  ;;  %s1245_s25 = smov 0   ;;  %s1247_s26 = smov 0  }
  0x13   :  { %s1249_s27 = smov 0   ;;  %s1251_s28 = smov 0  }
  0x14   :  { %s1253_s29 = smov 0   ;;  %s1255_s0 = smov 0  }
  0x15   :  { %s1257_s30 = smov 0  }
  0x16 LB: > { %1717 = sst [smem:[#allocation17_spill]] %s1182_s27  ;;  %s817_s5 = sadd.s32 4294967294, %s1198_s30   ;;  %s1198_s30 = sphi %s1257_s30, %s1753_s30   ;;  %s1194_s0 = sphi %s1255_s0, %s1752_s0   ;;  %s1190_s29 = sphi %s1253_s29, %s1751_s29   ;;  %s1186_s28 = sphi %s1251_s28, %s1750_s28   ;;  %s1182_s27 = sphi %s1249_s27, %s1746_s27   ;;  %s1178_s26 = sphi %s1247_s26, %s1749_s26   ;;  %s1174_s25 = sphi %s1245_s25, %s1748_s25  }
  0x17   : > { %s1282_s6 = sadd.s32 1, %s1198_s30   ;;  %p1704_p3 = scmp.eq.s32.totalorder %s1198_s30, 0 }
  0x18   : > { %s59_s7 = ssub.s32 %s1198_s30, %s1282_s6  ;;  %s62_s8 = sadd.s32 1, %s1182_s27 }
  0x19   : > { %p60_p4 = scmp.eq.s32.totalorder %s59_s7, 0  ;;  %p1705_p5 = scmp.ne.s32.totalorder %s1182_s27, %s1178_s26 }
  0x1a   : > { %p1706_p6 = scmp.ne.s32.totalorder %s1178_s26, %s1174_s25  ;;  %p131_p8 = scmp.eq.s32.totalorder %s817_s5, 2 }
  0x1b   : > { %s1293_s9 = scalar_select %p60_p4, %s1182_s27, %s62_s8  }
  0x1c   : > { %p71_p7 = por %p1705_p5, %p1704_p3  ;;  %p1703_p9 = scmp.lt.s32.totalorder %s1198_s30, 3 }
  0x1d   : > { %1718 = sst [smem:[#allocation18_spill]] %s1293_s9  ;;  %p1304_p10 = por %p131_p8, %p1706_p6 }
  0x1e   : > { %s171_s11 = sand.u32 1, %s1198_s30   ;;  %s173_s12 = sand.u32 1, %s1182_s27  }
  0x1f   : > { %s1719_s10 = scalar_select %p1304_p10, 1, 0 }
  0x20   : > { %s1310_s13 = sshll.u32 %s173_s12, 5  ;;  %s840_s14 = sshll.u32 %s1198_s30, 9 }
  0x21   : > { %s1720_s2 = sld [smem:[#allocation20_spill]]  ;;  %s175_s18 = scalar_lea.vmem [#allocation7], %s1310_s13 }
  0x22   : > { %s182_s19 = sshll.u32 %s175_s18, 4  ;;  %p1323_p11 = pnand %p1703_p9, %p71_p7  ;;  %s1327_s19 = int_to_ptr.vmem [resolvable:$true] %s182_s19 }
  0x23   : > { %s1329_s21 = scalar_lea.sflag [#allocation8], %s171_s11 }
  0x24   : > { %p1707_p13 = pneg %p1323_p11 }
  0x27   : > { %s1318_s17 = scalar_lea.hbm %s1720_s2, %s840_s14  ;;  %s1017_s5 = scalar_lea.hbm %s1720_s2, 1536 }
  0x28   : > { %s1012_s22 = scalar_lea.hbm %s1318_s17, 512  ;;  %p1018_p2 = scmp.lt.u32.totalorder %s1318_s17, %s1720_s2 }
  0x29   : > { %p1013_p12 = scmp.ne.s32.totalorder %s1318_s17, %s1012_s22  ;;  %p1019_p4 = scmp.lt.u32.totalorder %s1017_s5, %s1012_s22 }
  0x2a   : > { %p1021_p8 = scmp.lt.u32.totalorder %s1012_s22, %s1318_s17 }
  0x2b   : > { %p1015_p0 = pnand %p1707_p13, %p1013_p12  ;;  %p1020_p7 = por %p1019_p4, %p1018_p2 }
  0x2d   : > { %p1016_p1 = pneg %p1015_p0  ;;  %p1022_p9 = por %p1021_p8, %p1020_p7 }
  0x2f   : > { %p1023_p3 = pnand %p1022_p9, %p1016_p1 }
  0x31   : > { %1026 = shalt.err (!%p1023_p3)
}
  0x32   : > { %s1027_s11 = scalar_lea.vmem %s1327_s19, 512  ;;  %s1201_s12 = smov [#allocation7]  }
  0x33   : > { %p1028_p12 = scmp.ne.s32.totalorder %s1327_s19, %s1027_s11  ;;  %s1032_s15 = sshll.u32 %s1201_s12, 4  ;;  %s1033_s15 = int_to_ptr.vmem [resolvable:$false] %s1032_s15 }
  0x34   : > { %s1034_s16 = scalar_lea.vmem %s1033_s15, 1024  ;;  %p1035_p6 = scmp.lt.s32.totalorder %s1327_s19, %s1033_s15 }
  0x35   : > { %p1030_p0 = pnand %p1028_p12, %p1707_p13  ;;  %p1036_p2 = scmp.lt.s32.totalorder %s1034_s16, %s1027_s11 }
  0x37   : > { %p1031_p5 = pneg %p1030_p0  ;;  %p1037_p4 = por %p1036_p2, %p1035_p6 }
  0x39   : > { %p1038_p7 = pnand %p1037_p4, %p1031_p5 }
  0x3b   : > { %1041 = shalt.err (!%p1038_p7)
}
  0x3c   : > { %s1708_s18 = smov 256   ;;  %s1709_s22 = smov 16  }
  0x3d   : > { %925 = dma.hbm_to_vmem [thread:$0]  (!%p1323_p11), %s1318_s17, 512, %s1327_s19, %s1329_s21, %s1708_s18, %s1708_s18, %s1709_s22  }
  0x3e   : > { %p829_p3 = scmp.ge.s32.totalorder %s1198_s30, 1  ;;  %s1722_s3 = sld [smem:[#allocation21_spill]] }
  0x3f   : > { %p211_p5 = scmp.lt.s32.totalorder %s1198_s30, 4  ;;  %s1374_s8 = sadd.s32 4294967295, %s1198_s30  }
  0x40   : > { %s31_s17 = sld [smem:[#allocation3 + %s1198_s30]]  ;;  %s196_s11 = scalar_lea.vmem [#allocation9], %s1310_s13 }
  0x41   : > { %p1369_p6 = pnand %p829_p3, %p211_p5  ;;  %s32_s19 = sld [smem:[#allocation3 + %s1282_s6]] }
  0x42   : > { %s203_s12 = sshll.u32 %s196_s11, 4  ;;  %p43_p9 = scmp.ne.s32.totalorder %s1194_s0, %s1190_s29  ;;  %s1407_s12 = int_to_ptr.vmem [resolvable:$true] %s203_s12 }
  0x43   : > { %s1723_s7 = scalar_select %p1369_p6, 1, 0 }
  0x44   : > { %s1366_s5 = scalar_lea.hbm %s1722_s3, %s840_s14  ;;  %p49_p1 = scmp.ne.s32.totalorder %s1190_s29, %s1186_s28 }
  0x45   : > { %p50_p8 = scmp.eq.s32.totalorder %s1374_s8, 0  ;;  %s36_s14 = sadd.s32 1, %s1194_s0 }
  0x46   : > { %p125_p12 = scmp.eq.s32.totalorder %s1374_s8, 2  ;;  %p1725_p2 = scmp.ne.s32.totalorder %s1178_s26, %s1174_s25 }
  0x47   : > { %p1386_p0 = por %p50_p8, %p49_p1  ;;  %p1727_p7 = scmp.ne.s32.totalorder %s1182_s27, %s1178_s26 }
  0x48   : > { %p1393_p4 = por %p1725_p2, %p50_p8  ;;  %s1711_s13 = sand.u32 1, %s1194_s0  }
  0x49   : > { %s1724_s15 = scalar_select %p1386_p0, 1, 0 }
  0x4a   : > { %s1726_s16 = scalar_select %p1393_p4, 1, 0 }
  0x4b   : > { %p1400_p3 = por %p125_p12, %p1727_p7  ;;  %s33_s23 = ssub.s32 %s31_s17, %s32_s19 }
  0x4c   : > { %p1729_p5 = scmp.eq.s32.totalorder %s1198_s30, 0  ;;  %p34_p13 = scmp.eq.s32.totalorder %s33_s23, 0 }
  0x4d   : > { %s1728_s28 = scalar_select %p1400_p3, 1, 0 }
  0x4e   : > { %p45_p1 = por %p1729_p5, %p43_p9  ;;  %s1411_s24 = sshll.u32 %s1711_s13, 3 }
  0x4f   : > { %p1730_p8 = scmp.lt.s32.totalorder %s1198_s30, 3  ;;  %s1042_s19 = scalar_lea.hbm %s1366_s5, 512 }
  0x50   : > { %s1420_s18 = scalar_select %p34_p13, %s1194_s0, %s36_s14  }
  0x51   : > { %p1415_p2 = pnand %p1730_p8, %p45_p1  ;;  %p1733_p12 = pmov %p1730_p8 }
  0x52   : > { %1732 = sst [smem:[#allocation19_spill]] %s1420_s18  ;;  %p1734_p9 = pmov %p1730_p8 }
  0x53   : > { %s907_s22 = scalar_select %p45_p1, [#allocation3], [#allocation11] }
  0x54   : > { %s908_s2 = scalar_select %p45_p1, %s1198_s30, 0 }
  0x55   : > { %s1755_s22 = smov (!%p1733_p12, %s907_s22), [#allocation12]  ;;  %p1043_p7 = scmp.ne.s32.totalorder %s1366_s5, %s1042_s19 }
  0x56   : > { %s1757_s2 = smov (!%p1734_p9, %s908_s2), 0  ;;  %p1735_p5 = pneg %p1323_p11 }
  0x57   : > { %s1427_s17 = sld [smem:[%s1755_s22 + %s1757_s2]]  ;;  %s1047_s9 = scalar_lea.hbm %s1722_s3, 1536 }
  0x58   : > { %p1045_p10 = pnand %p1043_p7, %p1735_p5  ;;  %p1048_p13 = scmp.lt.u32.totalorder %s1366_s5, %s1722_s3 }
  0x59   : > { %p1049_p1 = scmp.lt.u32.totalorder %s1047_s9, %s1042_s19  ;;  %p1051_p12 = scmp.lt.u32.totalorder %s1042_s19, %s1366_s5 }
  0x5a   : > { %p1046_p3 = pneg %p1045_p10 }
  0x5b   : > { %p1050_p8 = por %p1049_p1, %p1048_p13 }
  0x5d   : > { %p1052_p9 = por %p1051_p12, %p1050_p8 }
  0x5f   : > { %p1053_p4 = pnand %p1052_p9, %p1046_p3 }
  0x61   : > { %1056 = shalt.err (!%p1053_p4)
}
  0x62   : > { %s1057_s2 = scalar_lea.vmem %s1407_s12, 512  ;;  %p1736_p7 = pmov %p1735_p5 }
  0x63   : > { %p1058_p10 = scmp.ne.s32.totalorder %s1407_s12, %s1057_s2  ;;  %s1204_s22 = smov [#allocation9]  }
  0x64   : > { %s1062_s13 = sshll.u32 %s1204_s22, 4  ;;  %s1063_s13 = int_to_ptr.vmem [resolvable:$false] %s1062_s13 }
  0x65   : > { %p1060_p5 = pnand %p1058_p10, %p1736_p7  ;;  %s1064_s18 = scalar_lea.vmem %s1063_s13, 1024 }
  0x66   : > { %p1065_p6 = scmp.lt.s32.totalorder %s1407_s12, %s1063_s13  ;;  %p1066_p13 = scmp.lt.s32.totalorder %s1064_s18, %s1057_s2 }
  0x67   : > { %p1061_p0 = pneg %p1060_p5 }
  0x68   : > { %p1067_p1 = por %p1066_p13, %p1065_p6 }
  0x6a   : > { %p1068_p8 = pnand %p1067_p1, %p1061_p0 }
  0x6c   : > { %1071 = shalt.err (!%p1068_p8)
}
  0x6d   : > { %s1737_s9 = smov 16   ;;  %s1738_s19 = smov 256  }
  0x6e   : > { %928 = dma.hbm_to_vmem [thread:$0]  (!%p1323_p11), %s1366_s5, 512, %s1407_s12, %s1329_s21, %s1738_s19, %s1738_s19, %s1737_s9  }
  0x6f   : > { %s155_s23 = scalar_lea.vmem [#allocation4], %s1411_s24  ;;  %s839_s2 = sshll.u32 %s1427_s17, 7 }
  0x70   : > { %s164_s14 = sshll.u32 %s155_s23, 4  ;;  %s1463_s20 = scalar_lea.hbm %s1699_s1, %s839_s2  ;;  %s1457_s14 = int_to_ptr.vmem [resolvable:$true] %s164_s14 }
  0x71   : > { %s1739_s18 = sand.u32 1, %s1194_s0   ;;  %s1072_s27 = scalar_lea.hbm %s1463_s20, 128 }
  0x72   : > { %s152_s3 = scalar_lea.sflag [#allocation5], %s1739_s18  ;;  %p1073_p6 = scmp.ne.s32.totalorder %s1463_s20, %s1072_s27 }
  0x73   : > { %p1074_p11 = pneg %p1415_p2  ;;  %s1077_s12 = scalar_lea.hbm %s1699_s1, 256 }
  0x74   : > { %p1078_p3 = scmp.lt.u32.totalorder %s1463_s20, %s1699_s1  ;;  %p1079_p12 = scmp.lt.u32.totalorder %s1077_s12, %s1072_s27 }
  0x75   : > { %p1075_p0 = pnand %p1074_p11, %p1073_p6  ;;  %p1081_p10 = scmp.lt.u32.totalorder %s1072_s27, %s1463_s20 }
  0x76   : > { %p1080_p9 = por %p1079_p12, %p1078_p3 }
  0x77   : > { %p1076_p4 = pneg %p1075_p0 }
  0x78   : > { %p1082_p7 = por %p1081_p10, %p1080_p9 }
  0x7a   : > { %p1083_p5 = pnand %p1082_p7, %p1076_p4 }
  0x7c   : > { %1086 = shalt.err (!%p1083_p5)
}
  0x7d   : > { %s1087_s9 = scalar_lea.vmem %s1457_s14, 128  ;;  %s1205_s19 = smov [#allocation4]  }
  0x7e   : > { %p1088_p13 = scmp.ne.s32.totalorder %s1457_s14, %s1087_s9  ;;  %s1092_s23 = sshll.u32 %s1205_s19, 4  ;;  %s1093_s23 = int_to_ptr.vmem [resolvable:$false] %s1092_s23 }
  0x7f   : > { %s1094_s2 = scalar_lea.vmem %s1093_s23, 256  ;;  %p1095_p6 = scmp.lt.s32.totalorder %s1457_s14, %s1093_s23 }
  0x80   : > { %p1090_p1 = pnand %p1088_p13, %p1074_p11  ;;  %p1096_p0 = scmp.lt.s32.totalorder %s1094_s2, %s1087_s9 }
  0x82   : > { %p1091_p8 = pneg %p1090_p1  ;;  %p1097_p3 = por %p1096_p0, %p1095_p6 }
  0x84   : > { %p1098_p12 = pnand %p1097_p3, %p1091_p8 }
  0x86   : > { %1101 = shalt.err (!%p1098_p12)
}
  0x87   : > { %922 = dma.hbm_to_vmem [thread:$0]  (!%p1415_p2), %s1463_s20, 128, %s1457_s14, %s152_s3  }
  0x88   : > { %p1740_p4 = scmp.ne.s32.totalorder %s1723_s7, 0 }
  0x89   : > { %s217_s27 = sand.u32 (!%p1740_p4), 1, %s1190_s29   ;;  %p1741_p11 = scmp.ne.s32.totalorder (!%p1740_p4), %s1724_s15, 0 }
  0x8a   : > { %215 = sbr.rel (%p1740_p4) target bundleno = 461 (0x1cd), region = 32  ;;  %s830_s22 = sshll.u32 (!%p1740_p4), %s217_s27, 3 }
  0x8b   : > { %s218_s13 = scalar_lea.sflag (!%p1740_p4), [#allocation5], %s217_s27  ;;  %s221_s18 = scalar_lea.vmem (!%p1740_p4), [#allocation4], %s830_s22 }
  0x91   : > { %1161 = dma.done.wait (%p1741_p11), %s218_s13, 128  }
  0x92   : > { %1163 = vsyncadd (%p1741_p11), %s218_s13, 4294967168  ;;  %s226_s11 = sand.u32 1, %s1374_s8   ;;  %s1501_s21 = sand.u32 1, %s1178_s26  }
  0x93   : > { %s831_s3 = sshll.u32 %s1501_s21, 5  ;;  %s227_s7 = scalar_lea.sflag [#allocation8], %s226_s11 }
  0x94   : > { %s1504_s14 = scalar_lea.vmem [#allocation7], %s831_s3  ;;  %p1742_p2 = scmp.ne.s32.totalorder %s1726_s16, 0 }
  0x96   : > { %1165 = dma.done.wait (%p1742_p2), %s227_s7, 1024  }
  0x97   : > { %1167 = vsyncadd (%p1742_p2), %s227_s7, 4294966272  ;;  %v290_v0 = vlaneseq  ;;  %v1206_v1 = vmov 1966171168   ;;  %v995_v6 = vld [vmem:[%s1504_s14] ss:$8 sps:$4 sm:$0xff]   ;;  %v1520_v12 = vld [vmem:[%s221_s18] sm:$0xff] }
  0x98   : > { %v288_v2 = vunpack.c.l.s4 %v1206_v1  ;;  %v997_v7 = vld [vmem:[%s1504_s14 + $0x4] ss:$8 sps:$4 sm:$0xff]   ;;  %s239_s15 = scalar_lea.vmem [#allocation9], %s831_s3  ;;  %v611_v19 = vcombine.high %v1520_v12, %v1520_v12  ;;  %v998_v59 = vld [vmem:[%s1504_s14 + $0x10] ss:$8 sps:$4 sm:$0xff]   ;;  %s833_s16 = sshll.u32 %s1501_s21, 3 }
  0x99   : > { %v291_v3 = vshrl.u32 %v290_v0, 7  ;;  %v1522_v13 = vld [vmem:[%s239_s15 + $0x8] sm:$0xff]  ;;  %v1525_v16 = vld [vmem:[%s239_s15 + $0x18] sm:$0xff]  ;;  %v1527_v17 = vld [vmem:[%s239_s15] sm:$0xff]  ;;  %s842_s20 = sshll.u32 %s1374_s8, 7  ;;  %s271_s5 = scalar_lea.vmem [#allocation10], %s833_s16 }
  0x9a   : > { %v289_v4 = vunpack.c.0.s8 %v288_v2  ;;  %v1529_v18 = vld [vmem:[%s239_s15 + $0x10] sm:$0xff]  ;;  %677 = vmatprep.mubr.f32.mxu0 %v611_v19  ;;  %s704_s12 = sshll.u32 %s271_s5, 4  ;;  %s1646_s9 = scalar_lea.hbm %s1702_s4, %s842_s20  ;;  %s1648_s12 = int_to_ptr.vmem [resolvable:$true] %s704_s12 }
  0x9b   : > { %v1515_v9 = vsub.s32 0, %v291_v3  ;;  %v1517_v10 = vsub.s32 1, %v291_v3  ;;  %s690_s19 = scalar_lea.sflag [#allocation6], %s1501_s21  ;;  %s1102_s23 = scalar_lea.vmem %s1648_s12, 128 }
  0x9c   : > { %v1510_v5 = vsub.s32 %v289_v4, %v291_v3  ;;  %p1103_p9 = scmp.ne.s32.totalorder %s1648_s12, %s1102_s23  ;;  %p1743_p10 = scmp.ne.s32.totalorder %s1728_s28, 0 }
  0x9d   : > { %s1207_s8 = smov [#allocation10]  }
  0x9e   : > { %v293_v8 = vrot.slane %v995_v6, %v1510_v5  ;;  %v300_v11 = vrot.slane %v997_v7, %v1510_v5  ;;  %v343_v6 = vrot.slane %v998_v59, %v1510_v5  ;;  %p1104_p7 = pnand %p1103_p9, %p1743_p10  ;;  %s1106_s2 = sshll.u32 %s1207_s8, 4  ;;  %s1107_s2 = int_to_ptr.vmem [resolvable:$false] %s1106_s2 }
  0x9f   : > { %s1108_s27 = scalar_lea.vmem %s1107_s2, 256  ;;  %p1109_p13 = scmp.lt.s32.totalorder %s1648_s12, %s1107_s2 }
  0xa0   : > { %v301_v14 = vcombine.high %v293_v8, %v293_v8  ;;  %v309_v15 = vrot.slane %v293_v8, %v1510_v5  ;;  %v316_v24 = vrot.slane %v300_v11, %v1510_v5  ;;  %v302_v36 = vcombine.high %v300_v11, %v300_v11  ;;  %p1105_p5 = pneg %p1104_p7  ;;  %p1110_p1 = scmp.lt.s32.totalorder %s1108_s27, %s1102_s23 }
  0xa2   : > { %v392_v20 = vrot.slane %v309_v15, %v1517_v10  ;;  %v388_v21 = vrot.slane %v309_v15, %v1515_v9  ;;  %v323_v22 = vrot.slane %v301_v14, %v1510_v5  ;;  %v331_v23 = vcombine.high %v309_v15, %v309_v15  ;;  %p1111_p8 = por %p1110_p1, %p1109_p13 }
  0xa3   : > { %v424_v50 = vrot.slane %v316_v24, %v1517_v10  ;;  %v330_v51 = vrot.slane %v302_v36, %v1510_v5  ;;  %v420_v54 = vrot.slane %v316_v24, %v1515_v9  ;;  %v332_v58 = vcombine.high %v316_v24, %v316_v24 }
  0xa4   : > { %v546_v25 = vmul.f32 %v392_v20, %v1522_v13  ;;  %v548_v26 = vmul.f32 %v392_v20, %v1525_v16  ;;  %v545_v27 = vmul.f32 %v388_v21, %v1527_v17  ;;  %v547_v28 = vmul.f32 %v388_v21, %v1529_v18  ;;  %p1112_p6 = pnand %p1111_p8, %p1105_p5 }
  0xa5   : > { %v400_v29 = vrot.slane %v323_v22, %v1517_v10  ;;  %v396_v30 = vrot.slane %v323_v22, %v1515_v9  ;;  %v408_v31 = vrot.slane %v331_v23, %v1517_v10  ;;  %v404_v32 = vrot.slane %v331_v23, %v1515_v9 }
  0xa6   : > { %v843_v33 = vpack.c.bf16 %v548_v26, %v546_v25  ;;  %v845_v34 = vpack.c.bf16 %v547_v28, %v545_v27  ;;  %v333_v35 = vcombine.high %v323_v22, %v323_v22  ;;  %v562_v61 = vmul.f32 %v424_v50, %v1522_v13 }
  0xa7   : > { %v550_v37 = vmul.f32 %v400_v29, %v1522_v13  ;;  %v552_v38 = vmul.f32 %v400_v29, %v1525_v16  ;;  %v549_v39 = vmul.f32 %v396_v30, %v1527_v17  ;;  %v551_v40 = vmul.f32 %v396_v30, %v1529_v18 }
  0xa8   : > { %844 = vmatprep.subr.bf16.mxu0 %v843_v33  ;;  %v554_v41 = vmul.f32 %v408_v31, %v1522_v13  ;;  %v556_v42 = vmul.f32 %v408_v31, %v1525_v16  ;;  %v553_v43 = vmul.f32 %v404_v32, %v1527_v17  ;;  %v555_v44 = vmul.f32 %v404_v32, %v1529_v18 }
  0xa9   : > { %846 = vmatpush1.bf16.msra.mxu0 %v845_v34  ;;  %v847_v45 = vpack.c.bf16 %v552_v38, %v550_v37  ;;  %v849_v46 = vpack.c.bf16 %v551_v40, %v549_v39  ;;  %v416_v47 = vrot.slane %v333_v35, %v1517_v10  ;;  %v412_v48 = vrot.slane %v333_v35, %v1515_v9  ;;  %v1000_v38 = vld [vmem:[%s1504_s14 + $0x14] ss:$8 sps:$4 sm:$0xff]  }
  0xaa   : > { %v851_v49 = vpack.c.bf16 %v556_v42, %v554_v41  ;;  %v853_v55 = vpack.c.bf16 %v555_v44, %v553_v43  ;;  %v564_v62 = vmul.f32 %v424_v50, %v1525_v16  ;;  %v432_v63 = vrot.slane %v330_v51, %v1517_v10 }
  0xab   : > { %848 = vmatprep.subr.bf16.mxu0 %v847_v45  ;;  %v558_v52 = vmul.f32 %v416_v47, %v1522_v13  ;;  %v560_v53 = vmul.f32 %v416_v47, %v1525_v16  ;;  %v557_v56 = vmul.f32 %v412_v48, %v1527_v17  ;;  %v559_v57 = vmul.f32 %v412_v48, %v1529_v18 }
  0xac   : > { %v561_v0 = vmul.f32 %v420_v54, %v1527_v17  ;;  %v563_v1 = vmul.f32 %v420_v54, %v1529_v18  ;;  %v428_v3 = vrot.slane %v330_v51, %v1515_v9  ;;  %v440_v4 = vrot.slane %v332_v58, %v1517_v10 }
  0xad   : > { %850 = vmatpush1.bf16.msra.mxu0 %v849_v46  ;;  %v855_v60 = vpack.c.bf16 %v560_v53, %v558_v52  ;;  %v857_v2 = vpack.c.bf16 %v559_v57, %v557_v56  ;;  %v859_v7 = vpack.c.bf16 %v564_v62, %v562_v61  ;;  %v566_v8 = vmul.f32 %v432_v63, %v1522_v13 }
  0xae   : > { %852 = vmatprep.subr.bf16.mxu0 %v851_v49  ;;  %v568_v11 = vmul.f32 %v432_v63, %v1525_v16  ;;  %v334_v14 = vcombine.high %v330_v51, %v330_v51  ;;  %v861_v15 = vpack.c.bf16 %v563_v1, %v561_v0  ;;  %v436_v19 = vrot.slane %v332_v58, %v1515_v9 }
  0xaf   : > { %v565_v20 = vmul.f32 %v428_v3, %v1527_v17  ;;  %v567_v21 = vmul.f32 %v428_v3, %v1529_v18  ;;  %v570_v22 = vmul.f32 %v440_v4, %v1522_v13  ;;  %v572_v23 = vmul.f32 %v440_v4, %v1525_v16 }
  0xb0   : > { %v863_v24 = vpack.c.bf16 %v568_v11, %v566_v8  ;;  %v448_v25 = vrot.slane %v334_v14, %v1517_v10  ;;  %v359_v26 = vrot.slane %v343_v6, %v1510_v5  ;;  %v351_v27 = vcombine.high %v343_v6, %v343_v6 }
  0xb1   : > { %854 = vmatpush1.bf16.msra.mxu0 %v853_v55  ;;  %v569_v28 = vmul.f32 %v436_v19, %v1527_v17  ;;  %v865_v29 = vpack.c.bf16 %v567_v21, %v565_v20  ;;  %v867_v30 = vpack.c.bf16 %v572_v23, %v570_v22  ;;  %v571_v31 = vmul.f32 %v436_v19, %v1529_v18 }
  0xb2   : > { %856 = vmatprep.subr.bf16.mxu0 %v855_v60  ;;  %v444_v32 = vrot.slane %v334_v14, %v1515_v9  ;;  %v574_v33 = vmul.f32 %v448_v25, %v1522_v13  ;;  %v576_v34 = vmul.f32 %v448_v25, %v1525_v16  ;;  %v456_v35 = vrot.slane %v359_v26, %v1517_v10 }
  0xb3   : > { %v373_v36 = vrot.slane %v351_v27, %v1510_v5  ;;  %v452_v37 = vrot.slane %v359_v26, %v1515_v9  ;;  %v869_v39 = vpack.c.bf16 %v571_v31, %v569_v28  ;;  %v381_v42 = vcombine.high %v359_v26, %v359_v26 }
  0xb4   : > { %v573_v40 = vmul.f32 %v444_v32, %v1527_v17  ;;  %v575_v41 = vmul.f32 %v444_v32, %v1529_v18  ;;  %v871_v43 = vpack.c.bf16 %v576_v34, %v574_v33  ;;  %v578_v44 = vmul.f32 %v456_v35, %v1522_v13 }
  0xb5   : > { %858 = vmatpush1.bf16.msra.mxu0 %v857_v2  ;;  %v580_v45 = vmul.f32 %v456_v35, %v1525_v16  ;;  %v464_v46 = vrot.slane %v373_v36, %v1517_v10  ;;  %v577_v47 = vmul.f32 %v452_v37, %v1527_v17  ;;  %v579_v48 = vmul.f32 %v452_v37, %v1529_v18 }
  0xb6   : > { %860 = vmatprep.subr.bf16.mxu0 %v859_v7  ;;  %v350_v49 = vrot.slane %v1000_v38, %v1510_v5  ;;  %v873_v50 = vpack.c.bf16 %v575_v41, %v573_v40  ;;  %v460_v51 = vrot.slane %v373_v36, %v1515_v9  ;;  %v472_v52 = vrot.slane %v381_v42, %v1517_v10 }
  0xb7   : > { %v875_v53 = vpack.c.bf16 %v580_v45, %v578_v44  ;;  %v582_v54 = vmul.f32 %v464_v46, %v1522_v13  ;;  %v584_v55 = vmul.f32 %v464_v46, %v1525_v16  ;;  %v383_v56 = vcombine.high %v373_v36, %v373_v36 }
  0xb8   : > { %v877_v57 = vpack.c.bf16 %v579_v48, %v577_v47  ;;  %v366_v58 = vrot.slane %v350_v49, %v1510_v5  ;;  %v581_v59 = vmul.f32 %v460_v51, %v1527_v17  ;;  %v583_v60 = vmul.f32 %v460_v51, %v1529_v18 }
  0xb9   : > { %862 = vmatpush1.bf16.msra.mxu0 %v861_v15  ;;  %v586_v61 = vmul.f32 %v472_v52, %v1522_v13  ;;  %v468_v62 = vrot.slane %v381_v42, %v1515_v9  ;;  %v879_v63 = vpack.c.bf16 %v584_v55, %v582_v54  ;;  %v588_v0 = vmul.f32 %v472_v52, %v1525_v16 }
  0xba   : > { %864 = vmatprep.subr.bf16.mxu0 %v863_v24  ;;  %v480_v1 = vrot.slane %v383_v56, %v1517_v10  ;;  %v352_v2 = vcombine.high %v350_v49, %v350_v49  ;;  %v488_v3 = vrot.slane %v366_v58, %v1517_v10  ;;  %v881_v4 = vpack.c.bf16 %v583_v60, %v581_v59 }
  0xbb   : > { %v585_v6 = vmul.f32 %v468_v62, %v1527_v17  ;;  %v587_v7 = vmul.f32 %v468_v62, %v1529_v18  ;;  %v476_v8 = vrot.slane %v383_v56, %v1515_v9  ;;  %v883_v11 = vpack.c.bf16 %v588_v0, %v586_v61 }
  0xbc   : > { %v590_v14 = vmul.f32 %v480_v1, %v1522_v13  ;;  %v592_v15 = vmul.f32 %v480_v1, %v1525_v16  ;;  %v380_v19 = vrot.slane %v352_v2, %v1510_v5  ;;  %v594_v20 = vmul.f32 %v488_v3, %v1522_v13 }
  0xbd   : > { %866 = vmatpush1.bf16.msra.mxu0 %v865_v29  ;;  %v596_v21 = vmul.f32 %v488_v3, %v1525_v16  ;;  %v885_v22 = vpack.c.bf16 %v587_v7, %v585_v6  ;;  %v589_v23 = vmul.f32 %v476_v8, %v1527_v17  ;;  %v591_v24 = vmul.f32 %v476_v8, %v1529_v18 }
  0xbe   : > { %868 = vmatprep.subr.bf16.mxu0 %v867_v30  ;;  %v484_v25 = vrot.slane %v366_v58, %v1515_v9  ;;  %v887_v26 = vpack.c.bf16 %v592_v15, %v590_v14  ;;  %v496_v27 = vrot.slane %v380_v19, %v1517_v10  ;;  %v382_v28 = vcombine.high %v366_v58, %v366_v58 }
  0xbf   : > { %v891_v29 = vpack.c.bf16 %v596_v21, %v594_v20  ;;  %v889_v5 = vpack.c.bf16 %v591_v24, %v589_v23  ;;  %v492_v32 = vrot.slane %v380_v19, %v1515_v9  ;;  %v384_v36 = vcombine.high %v380_v19, %v380_v19 }
  0xc0   : > { %v593_v30 = vmul.f32 %v484_v25, %v1527_v17  ;;  %v595_v31 = vmul.f32 %v484_v25, %v1529_v18  ;;  %v598_v33 = vmul.f32 %v496_v27, %v1522_v13  ;;  %v600_v34 = vmul.f32 %v496_v27, %v1525_v16 }
  0xc1   : > { %870 = vmatpush1.bf16.msra.mxu0 %v869_v39  ;;  %v504_v35 = vrot.slane %v382_v28, %v1517_v10  ;;  %v597_v38 = vmul.f32 %v492_v32, %v1527_v17  ;;  %v599_v39 = vmul.f32 %v492_v32, %v1529_v18  ;;  %v500_v40 = vrot.slane %v382_v28, %v1515_v9 }
  0xc2   : > { %872 = vmatprep.subr.bf16.mxu0 %v871_v43  ;;  %v893_v37 = vpack.c.bf16 %v595_v31, %v593_v30  ;;  %v895_v41 = vpack.c.bf16 %v600_v34, %v598_v33  ;;  %v512_v44 = vrot.slane %v384_v36, %v1517_v10  ;;  %v508_v48 = vrot.slane %v384_v36, %v1515_v9 }
  0xc3   : > { %v602_v42 = vmul.f32 %v504_v35, %v1522_v13  ;;  %v604_v43 = vmul.f32 %v504_v35, %v1525_v16  ;;  %v897_v45 = vpack.c.bf16 %v599_v39, %v597_v38  ;;  %v601_v46 = vmul.f32 %v500_v40, %v1527_v17 }
  0xc4   : > { %v603_v47 = vmul.f32 %v500_v40, %v1529_v18  ;;  %v608_v51 = vmul.f32 %v512_v44, %v1525_v16  ;;  %v605_v10 = vmul.f32 %v508_v48, %v1527_v17 }
  0xc5   : > { %874 = vmatpush1.bf16.msra.mxu0 %v873_v50  ;;  %v899_v49 = vpack.c.bf16 %v604_v43, %v602_v42  ;;  %v606_v50 = vmul.f32 %v512_v44, %v1522_v13 }
  0xc6   : > { %876 = vmatprep.subr.bf16.mxu0 %v875_v53  ;;  %v901_v52 = vpack.c.bf16 %v603_v47, %v601_v46  ;;  %v607_v53 = vmul.f32 %v508_v48, %v1529_v18 }
  0xc7   : > { %v903_v54 = vpack.c.bf16 %v608_v51, %v606_v50 }
  0xc8   : > { %v905_v55 = vpack.c.bf16 %v607_v53, %v605_v10 }
  0xc9   : > { %878 = vmatpush1.bf16.msra.mxu0 %v877_v57 }
  0xca   : > { %880 = vmatprep.subr.bf16.mxu0 %v879_v63 }
  0xcd   : > { %882 = vmatpush1.bf16.msra.mxu0 %v881_v4 }
  0xce   : > { %884 = vmatprep.subr.bf16.mxu0 %v883_v11 }
  0xd1   : > { %886 = vmatpush1.bf16.msra.mxu0 %v885_v22 }
  0xd2   : > { %888 = vmatprep.subr.bf16.mxu0 %v887_v26 }
  0xd5   : > { %890 = vmatpush1.bf16.msra.mxu0 %v889_v5 }
  0xd6   : > { %892 = vmatprep.subr.bf16.mxu0 %v891_v29 }
  0xd9   : > { %894 = vmatpush1.bf16.msra.mxu0 %v893_v37 }
  0xda   : > { %896 = vmatprep.subr.bf16.mxu0 %v895_v41 }
  0xdd   : > { %898 = vmatpush1.bf16.msra.mxu0 %v897_v45 }
  0xde   : > { %900 = vmatprep.subr.bf16.mxu0 %v899_v49 }
  0xe1   : > { %902 = vmatpush1.bf16.msra.mxu0 %v901_v52 }
  0xe2   : > { %904 = vmatprep.subr.bf16.mxu0 %v903_v54 }
  0xe5   : > { %906 = vmatpush1.bf16.msra.mxu0 %v905_v55 }
  0xe8   : > { %678 = vmatmul.mubr.f32.vlgmr.msra.gmra.mrb[0].mxu0 %v1520_v12 }
 0x1bb   : > { %v679_v9 = vpop.f32.mrb[0].mxu0 }
 0x1bc   : > { %v681_v13 = vpop.f32.mrb[1].mxu0 }
 0x1bd   : > { %v686_v16 = vcombine.low %v679_v9, %v681_v13 }
 0x1bf   : > { %688 = vst [vmem:[%s271_s5] sm:$0xff] %v686_v16 }
 0x1c0   : > { %1115 = shalt.err (!%p1112_p6)
}
 0x1c1   : > { %s1116_s22 = scalar_lea.hbm %s1646_s9, 128  ;;  %s1120_s11 = scalar_lea.hbm %s1702_s4, 384 }
 0x1c2   : > { %p1117_p0 = scmp.ne.s32.totalorder %s1646_s9, %s1116_s22  ;;  %p1121_p4 = scmp.lt.u32.totalorder %s1646_s9, %s1702_s4 }
 0x1c3   : > { %p1122_p11 = scmp.lt.u32.totalorder %s1120_s11, %s1116_s22  ;;  %p1124_p9 = scmp.lt.u32.totalorder %s1116_s22, %s1646_s9 }
 0x1c4   : > { %p1118_p3 = pnand %p1117_p0, %p1743_p10 }
 0x1c5   : > { %p1123_p2 = por %p1122_p11, %p1121_p4 }
 0x1c6   : > { %p1119_p12 = pneg %p1118_p3 }
 0x1c7   : > { %p1125_p7 = por %p1124_p9, %p1123_p2 }
 0x1c9   : > { %p1126_p5 = pnand %p1125_p7, %p1119_p12 }
 0x1cb   : > { %1129 = shalt.err (!%p1126_p5)
}
 0x1cc   : > { %915 = dma.vmem_to_hbm [thread:$0]  (%p1743_p10), %s1648_s12, 128, %s1646_s9, %s690_s19  }
 0x1cd PF: > { %p934_p13 = scmp.ge.s32.totalorder %s1198_s30, 2  ;;  %s716_s7 = sand.u32 1, %s1174_s25  }
 0x1ce   : > { %p1744_p1 = scmp.ne.s32.totalorder %s1719_s10, 0  ;;  %s717_s14 = scalar_lea.sflag [#allocation6], %s716_s7 }
 0x1d0   : > { %p930_p8 = pnand %p934_p13, %p1744_p1 }
 0x1d2   : > { %1169 = dma.done.wait (!%p930_p8), %s717_s14, 128  }
 0x1d3   : > { %1171 = vsyncadd (!%p930_p8), %s717_s14, 4294967168  ;;  %s1745_s15 = sld [smem:[#allocation17_spill]]  ;;  %s1746_s27 = sld [smem:[#allocation18_spill]] }
 0x1d4   : > { %s1747_s16 = sld [smem:[#allocation19_spill]]  ;;  %p24_p10 = scmp.ge.s32.totalorder %s1282_s6, 5  }
 0x1d5   : > { %s1748_s25 = smov %s1178_s26  ;;  %s1750_s28 = smov %s1190_s29 }
 0x1d6   : > { %s1751_s29 = smov %s1194_s0  ;;  %s1753_s30 = smov %s1282_s6 }
 0x1d7   :  { %26 = sbr.rel (!%p24_p10) target bundleno = 22 (0x16), region = 101 }
 0x1d9   : > { %s1749_s26 = smov %s1745_s15 }
 0x1da   : > { %s1752_s0 = smov %s1747_s16 }
 0x1de   :  { %722 = vsyncpa [#allocation5], 1 }
 0x1df   :  { %724 = vsyncpa [#allocation5 + $0x1], 1 }
 0x1e0   :  { %725 = vsyncpa [#allocation8], 1 }
 0x1e1   :  { %727 = vsyncpa [#allocation8 + $0x1], 1 }
 0x1e2   :  { %728 = vsyncpa [#allocation6], 1 }
 0x1e3   :  { %730 = vsyncpa [#allocation6 + $0x1], 1 }

</bundles_post_ra>
